<compile_context>
chip_gen: v6e
topology: v6e:2x2x1
jax: 0.10.0
libtpu: 0.0.40
codegen_flags: <defaults>
</compile_context>

<pallas_src>
import functools

import jax
import jax.numpy as jnp
from jax.experimental import pallas as pl
from jax.experimental.pallas import tpu as pltpu


def _vmem_ceiling_bytes():
    """~85% of this generation's physical VMEM (128 MiB v5e/v6e, 64 MiB v7x)."""
    try:
        cap = int(pltpu.get_tpu_info().vmem_capacity_bytes)
    except Exception:
        cap = 128 << 20  # conservative fallback (v5e/v6e physical)
    return max(32 << 20, int(cap * 0.85))


# --------------------------------------------------------------------------
# Fused single-pass kernel: a block of Bt full samples per grid step.
# --------------------------------------------------------------------------
def _adailn_fused_kernel(x_ref, gamma_ref, beta_ref, rho_ref, o_ref, *, eps):
    # x_ref: (Bt, C, HW); gamma/beta: (Bt, C, 1); rho: (1, C, 1)
    x = x_ref[...].astype(jnp.float32)
    _, C, HW = x.shape

    # Single streaming pass: per-(sample, channel) sum and sum-of-squares.
    sum_c = jnp.sum(x, axis=2, keepdims=True)        # (Bt, C, 1)
    ssq_c = jnp.sum(x * x, axis=2, keepdims=True)     # (Bt, C, 1)
    # `x` is dead here; the epilogue re-reads x_ref so the f32 copy is not
    # held live across the coefficient math (smaller peak VMEM).

    inv_hw = 1.0 / HW
    in_mean = sum_c * inv_hw
    # torch.var default is unbiased (divide by N-1); guard avoids a trace-time
    # ZeroDivisionError for HW == 1 (torch returns NaN there anyway).
    in_var = (ssq_c - sum_c * in_mean) * (1.0 / max(HW - 1, 1))

    n_ln = C * HW
    ln_sum = jnp.sum(sum_c, axis=1, keepdims=True)    # (Bt, 1, 1)
    ln_ssq = jnp.sum(ssq_c, axis=1, keepdims=True)    # (Bt, 1, 1)
    ln_mean = ln_sum * (1.0 / n_ln)
    ln_var = (ln_ssq - ln_sum * ln_mean) * (1.0 / max(n_ln - 1, 1))

    # rsqrt on tiny (Bt, C, 1) stats vectors (EUP slot, effectively free).
    s_in = jax.lax.rsqrt(in_var + eps)
    s_ln = jax.lax.rsqrt(ln_var + eps)

    rho = rho_ref[...].astype(jnp.float32)            # (1, C, 1)
    gamma = gamma_ref[...].astype(jnp.float32)        # (Bt, C, 1)
    beta = beta_ref[...].astype(jnp.float32)          # (Bt, C, 1)

    w_in = rho * s_in
    w_ln = (1.0 - rho) * s_ln
    a_coef = gamma * (w_in + w_ln)                                   # (Bt, C, 1)
    b_coef = beta - gamma * (w_in * in_mean + w_ln * ln_mean)        # (Bt, C, 1)

    # Single broadcast FMA epilogue; re-read x_ref (no live full-tile temp).
    o_ref[...] = (a_coef * x_ref[...].astype(jnp.float32)
                  + b_coef).astype(o_ref.dtype)


# --------------------------------------------------------------------------
# Two-phase (HW-tiled) path kernels.
# --------------------------------------------------------------------------
def _adailn_stats_kernel(x_ref, sum_ref, ssq_ref, *, hw_total, t_hw, needs_mask):
    # x_ref: (1, C, t_hw); outputs accumulate per-channel sums across HW tiles.
    t = pl.program_id(1)

    @pl.when(t == 0)
    def _():
        sum_ref[...] = jnp.zeros_like(sum_ref)
        ssq_ref[...] = jnp.zeros_like(ssq_ref)

    x = x_ref[...].astype(jnp.float32)
    if needs_mask:
        col = jax.lax.broadcasted_iota(jnp.int32, x.shape, 2) + t * t_hw
        x = jnp.where(col < hw_total, x, 0.0)

    sum_ref[...] += jnp.sum(x, axis=2, keepdims=True)
    ssq_ref[...] += jnp.sum(x * x, axis=2, keepdims=True)


def _adailn_apply_kernel(x_ref, a_ref, b_ref, o_ref):
    # Pure streaming FMA:  out = A * x + B  with per-channel coefficients.
    o_ref[...] = (a_ref[...] * x_ref[...].astype(jnp.float32)
                  + b_ref[...]).astype(o_ref.dtype)


# --------------------------------------------------------------------------
# Wrapper
# --------------------------------------------------------------------------
def adailn(x, gamma, beta, rho, *, eps=1e-5, force_tiled=False):
    """AdaILN forward.

    x:     (B, C, H, W)  float32 or bfloat16 activations
    gamma: (B, C)        per-sample adaptive scale
    beta:  (B, C)        per-sample adaptive bias
    rho:   (1, C, 1, 1)  learned mixing parameter
    """
    B, C, H, W = x.shape
    HW = H * W
    itemsize = jnp.dtype(x.dtype).itemsize

    x3 = x.reshape(B, C, HW)
    g3 = gamma.reshape(B, C, 1)
    b3 = beta.reshape(B, C, 1)
    r3 = rho.reshape(1, C, 1)

    vmem_ceiling = _vmem_ceiling_bytes()
    budget = vmem_ceiling - (2 << 20)  # headroom for semaphores/runtime scratch

    # Fused-path per-sample VMEM footprint: double-buffered in/out blocks plus
    # ~3 full-tile f32 temporaries during the stats reductions.
    per_sample_io = C * HW * itemsize
    per_sample_tmp = C * HW * 4
    per_sample_cost = 4 * per_sample_io + 3 * per_sample_tmp

    use_fused = (not force_tiled) and (per_sample_cost <= budget)

    if use_fused:
        # Pack several batch samples per block so tiny tiles amortize the
        # fixed per-grid-step overhead (target a few-MiB x block).
        bt_target = max(1, (4 << 20) // max(1, per_sample_io))
        bt_cap = max(1, budget // per_sample_cost)
        Bt = int(min(B, bt_target, bt_cap))
        while B % Bt != 0:  # keep blocks exact (no partial batch rows)
            Bt -= 1

        vmem_needed = Bt * per_sample_cost + (2 << 20)
        vmem_limit = int(min(max(vmem_needed, 32 << 20), vmem_ceiling))

        out = pl.pallas_call(
            functools.partial(_adailn_fused_kernel, eps=eps),
            out_shape=jax.ShapeDtypeStruct((B, C, HW), x.dtype),
            grid=(B // Bt,),
            in_specs=[
                pl.BlockSpec((Bt, C, HW), lambda b: (b, 0, 0)),
                pl.BlockSpec((Bt, C, 1), lambda b: (b, 0, 0)),
                pl.BlockSpec((Bt, C, 1), lambda b: (b, 0, 0)),
                pl.BlockSpec((1, C, 1), lambda b: (0, 0, 0)),
            ],
            out_specs=pl.BlockSpec((Bt, C, HW), lambda b: (b, 0, 0)),
            compiler_params=pltpu.CompilerParams(
                dimension_semantics=("parallel",),
                vmem_limit_bytes=vmem_limit,
            ),
            cost_estimate=pl.CostEstimate(
                flops=8 * B * C * HW,
                transcendentals=2 * B * C,
                bytes_accessed=2 * B * C * HW * itemsize + 3 * B * C * 4,
            ),
        )(x3, g3, b3, r3)
        return out.reshape(B, C, H, W)

    # ---- HW-tiled two-phase path (block too large for single-pass VMEM) ----
    # TODO(synk): on multi-TensorCore parts with B == 1 it can pay to take this
    # path even when the fused block fits, so both cores get (B, hw-tile) work.
    if HW <= 256:
        t_hw = HW
    else:
        t_hw = min(HW, max(512, (2 << 20) // max(1, C * itemsize)))
        t_hw = max(128, (t_hw // 128) * 128)  # lane-dense tiles (unmasked vst)
        t_hw = min(t_hw, HW)
    n_t = int(pl.cdiv(HW, t_hw))
    needs_mask = (HW % t_hw) != 0

    tile_io = C * t_hw * itemsize
    tile_tmp = C * t_hw * 4
    vmem_needed = 4 * tile_io + 3 * tile_tmp + (2 << 20)
    vmem_limit = int(min(max(vmem_needed, 32 << 20), vmem_ceiling))

    # Phase 1: per-channel sum / sum-of-squares accumulated across HW tiles.
    sum_c, ssq_c = pl.pallas_call(
        functools.partial(_adailn_stats_kernel, hw_total=HW, t_hw=t_hw,
                          needs_mask=needs_mask),
        out_shape=(jax.ShapeDtypeStruct((B, C, 1), jnp.float32),
                   jax.ShapeDtypeStruct((B, C, 1), jnp.float32)),
        grid=(B, n_t),
        in_specs=[pl.BlockSpec((1, C, t_hw), lambda b, t: (b, 0, t))],
        out_specs=(pl.BlockSpec((1, C, 1), lambda b, t: (b, 0, 0)),
                   pl.BlockSpec((1, C, 1), lambda b, t: (b, 0, 0))),
        compiler_params=pltpu.CompilerParams(
            dimension_semantics=("parallel", "arbitrary"),
            vmem_limit_bytes=vmem_limit,
        ),
        cost_estimate=pl.CostEstimate(
            flops=3 * B * C * HW,
            transcendentals=0,
            bytes_accessed=B * C * HW * itemsize + 2 * B * C * 4,
        ),
    )(x3)

    # Tiny per-(sample, channel) coefficient math in plain JAX / f32.
    in_mean = sum_c / HW                                           # (B, C, 1)
    in_var = (ssq_c - sum_c * in_mean) / max(HW - 1, 1)            # unbiased
    n_ln = C * HW
    ln_sum = jnp.sum(sum_c, axis=1, keepdims=True)                 # (B, 1, 1)
    ln_ssq = jnp.sum(ssq_c, axis=1, keepdims=True)                 # (B, 1, 1)
    ln_mean = ln_sum / n_ln
    ln_var = (ln_ssq - ln_sum * ln_mean) / max(n_ln - 1, 1)
    s_in = jax.lax.rsqrt(in_var + eps)
    s_ln = jax.lax.rsqrt(ln_var + eps)
    rho_f = r3.astype(jnp.float32)                                 # (1, C, 1)
    g_f = g3.astype(jnp.float32)
    bt_f = b3.astype(jnp.float32)
    w_in = rho_f * s_in
    w_ln = (1.0 - rho_f) * s_ln
    a_coef = g_f * (w_in + w_ln)                                   # (B, C, 1)
    b_coef = bt_f - g_f * (w_in * in_mean + w_ln * ln_mean)        # (B, C, 1)

    # Phase 2: re-stream x tiles and apply the fused FMA (both axes parallel).
    out = pl.pallas_call(
        _adailn_apply_kernel,
        out_shape=jax.ShapeDtypeStruct((B, C, HW), x.dtype),
        grid=(B, n_t),
        in_specs=[
            pl.BlockSpec((1, C, t_hw), lambda b, t: (b, 0, t)),
            pl.BlockSpec((1, C, 1), lambda b, t: (b, 0, 0)),
            pl.BlockSpec((1, C, 1), lambda b, t: (b, 0, 0)),
        ],
        out_specs=pl.BlockSpec((1, C, t_hw), lambda b, t: (b, 0, t)),
        compiler_params=pltpu.CompilerParams(
            dimension_semantics=("parallel", "parallel"),
            vmem_limit_bytes=vmem_limit,
        ),
        cost_estimate=pl.CostEstimate(
            flops=2 * B * C * HW,
            transcendentals=0,
            bytes_accessed=2 * B * C * HW * itemsize + 2 * B * C * 4,
        ),
    )(x3, a_coef, b_coef)
    return out.reshape(B, C, H, W)


def adailn_ref(x, gamma, beta, rho, *, eps=1e-5):
    """Pure-JAX reference mirroring the PyTorch forward (unbiased variance)."""
    B, C, H, W = x.shape
    scale = gamma[:, :, None, None]
    bias = beta[:, :, None, None]
    xf = x.reshape(B, C, -1).astype(jnp.float32)
    in_mean = jnp.mean(xf, axis=2)[:, :, None, None]
    in_var = jnp.var(xf, axis=2, ddof=1)[:, :, None, None]
    a_in = (x.astype(jnp.float32) - in_mean) / jnp.sqrt(in_var + eps)
    xb = x.reshape(B, -1).astype(jnp.float32)
    ln_mean = jnp.mean(xb, axis=1)[:, None, None, None]
    ln_var = jnp.var(xb, axis=1, ddof=1)[:, None, None, None]
    a_ln = (x.astype(jnp.float32) - ln_mean) / jnp.sqrt(ln_var + eps)
    rho_b = jnp.broadcast_to(rho, (B, C, 1, 1))
    return (scale * (rho_b * a_in + (1.0 - rho_b) * a_ln) + bias).astype(x.dtype)


if __name__ == "__main__":
    eps = 1e-5
    key = jax.random.PRNGKey(0)
    kx, kg, kb, kx2, kg2, kb2 = jax.random.split(key, 6)

    # --- Fused single-pass path (small block, batch-packed) ---
    B, C, H, W = 2, 4, 16, 16
    x = jax.random.normal(kx, (B, C, H, W), dtype=jnp.float32)
    gamma = jax.random.normal(kg, (B, C), dtype=jnp.float32)
    beta = jax.random.normal(kb, (B, C), dtype=jnp.float32)
    rho = jnp.full((1, C, 1, 1), 0.9, dtype=jnp.float32)  # torch init 0.9

    out = jax.block_until_ready(adailn(x, gamma, beta, rho, eps=eps))
    ref = adailn_ref(x, gamma, beta, rho, eps=eps)
    if not jnp.allclose(out, ref, atol=1e-4, rtol=1e-4):
        raise AssertionError("Pallas AdaILN (fused path) does not match reference")

    # --- HW-tiled two-phase path (forced; exercises accumulation + masking) ---
    B2, C2, H2, W2 = 2, 8, 24, 24  # HW = 576 -> 512-wide tiles, last tile masked
    x2 = jax.random.normal(kx2, (B2, C2, H2, W2), dtype=jnp.float32)
    gamma2 = jax.random.normal(kg2, (B2, C2), dtype=jnp.float32)
    beta2 = jax.random.normal(kb2, (B2, C2), dtype=jnp.float32)
    rho2 = jnp.full((1, C2, 1, 1), 0.9, dtype=jnp.float32)

    out2 = jax.block_until_ready(
        adailn(x2, gamma2, beta2, rho2, eps=eps, force_tiled=True))
    ref2 = adailn_ref(x2, gamma2, beta2, rho2, eps=eps)
    if not jnp.allclose(out2, ref2, atol=1e-4, rtol=1e-4):
        raise AssertionError("Pallas AdaILN (tiled path) does not match reference")

    print("KERNEL_OK")
</pallas_src>

<mosaic_0001>
module attributes {stable_mosaic.version = 11 : i64} {
  func.func @_adailn_fused_kernel(%arg0: i32, %arg1: memref<2x4x256xf32, #tpu.memory_space<vmem>>, %arg2: memref<2x4x1xf32, #tpu.memory_space<vmem>>, %arg3: memref<2x4x1xf32, #tpu.memory_space<vmem>>, %arg4: memref<1x4x1xf32, #tpu.memory_space<vmem>>, %arg5: memref<2x4x256xf32, #tpu.memory_space<vmem>>) attributes {dimension_semantics = [#tpu.dimension_semantics<parallel>], iteration_bounds = array<i64: 1>, scalar_prefetch = 0 : i64, scratch_operands = 0 : i64, tpu.core_type = #tpu.core_type<tc>, window_params = [{transform_indices = @transform_0, window_bounds = array<i64: 2, 4, 256>}, {transform_indices = @transform_1, window_bounds = array<i64: 2, 4, 1>}, {transform_indices = @transform_2, window_bounds = array<i64: 2, 4, 1>}, {pipeline_mode = #tpu.pipeline_mode<synchronous>, transform_indices = @transform_3, window_bounds = array<i64: 1, 4, 1>}, {transform_indices = @transform_4, window_bounds = array<i64: 2, 4, 256>}]} {
    %c0 = arith.constant 0 : index
    %c0_0 = arith.constant 0 : index
    %c0_1 = arith.constant 0 : index
    %0 = vector.load %arg1[%c0, %c0_0, %c0_1] : memref<2x4x256xf32, #tpu.memory_space<vmem>>, vector<2x4x256xf32>
    %cst = arith.constant dense<0.000000e+00> : vector<2x4xf32>
    %1 = vector.multi_reduction <add>, %0, %cst [2] : vector<2x4x256xf32> to vector<2x4xf32>
    %2 = vector.shape_cast %1 : vector<2x4xf32> to vector<2x4x1xf32>
    %3 = arith.mulf %0, %0 : vector<2x4x256xf32>
    %cst_2 = arith.constant dense<0.000000e+00> : vector<2x4xf32>
    %4 = vector.multi_reduction <add>, %3, %cst_2 [2] : vector<2x4x256xf32> to vector<2x4xf32>
    %5 = vector.shape_cast %4 : vector<2x4xf32> to vector<2x4x1xf32>
    %cst_3 = arith.constant 3.906250e-03 : f32
    %6 = vector.broadcast %cst_3 : f32 to vector<2x4x1xf32>
    %7 = arith.mulf %2, %6 : vector<2x4x1xf32>
    %8 = arith.mulf %2, %7 : vector<2x4x1xf32>
    %9 = arith.subf %5, %8 : vector<2x4x1xf32>
    %cst_4 = arith.constant 0.00392156886 : f32
    %10 = vector.broadcast %cst_4 : f32 to vector<2x4x1xf32>
    %11 = arith.mulf %9, %10 : vector<2x4x1xf32>
    %cst_5 = arith.constant dense<0.000000e+00> : vector<2x1xf32>
    %12 = vector.multi_reduction <add>, %2, %cst_5 [1] : vector<2x4x1xf32> to vector<2x1xf32>
    %13 = vector.shape_cast %12 : vector<2x1xf32> to vector<2x1x1xf32>
    %cst_6 = arith.constant dense<0.000000e+00> : vector<2x1xf32>
    %14 = vector.multi_reduction <add>, %5, %cst_6 [1] : vector<2x4x1xf32> to vector<2x1xf32>
    %15 = vector.shape_cast %14 : vector<2x1xf32> to vector<2x1x1xf32>
    %cst_7 = arith.constant 9.765625E-4 : f32
    %16 = vector.broadcast %cst_7 : f32 to vector<2x1x1xf32>
    %17 = arith.mulf %13, %16 : vector<2x1x1xf32>
    %18 = arith.mulf %13, %17 : vector<2x1x1xf32>
    %19 = arith.subf %15, %18 : vector<2x1x1xf32>
    %cst_8 = arith.constant 9.77517105E-4 : f32
    %20 = vector.broadcast %cst_8 : f32 to vector<2x1x1xf32>
    %21 = arith.mulf %19, %20 : vector<2x1x1xf32>
    %cst_9 = arith.constant 9.99999974E-6 : f32
    %22 = vector.broadcast %cst_9 : f32 to vector<2x4x1xf32>
    %23 = arith.addf %11, %22 : vector<2x4x1xf32>
    %24 = math.rsqrt %23 : vector<2x4x1xf32>
    %cst_10 = arith.constant 9.99999974E-6 : f32
    %25 = vector.broadcast %cst_10 : f32 to vector<2x1x1xf32>
    %26 = arith.addf %21, %25 : vector<2x1x1xf32>
    %27 = math.rsqrt %26 : vector<2x1x1xf32>
    %c0_11 = arith.constant 0 : index
    %c0_12 = arith.constant 0 : index
    %c0_13 = arith.constant 0 : index
    %28 = vector.load %arg4[%c0_11, %c0_12, %c0_13] : memref<1x4x1xf32, #tpu.memory_space<vmem>>, vector<1x4x1xf32>
    %c0_14 = arith.constant 0 : index
    %c0_15 = arith.constant 0 : index
    %c0_16 = arith.constant 0 : index
    %29 = vector.load %arg2[%c0_14, %c0_15, %c0_16] : memref<2x4x1xf32, #tpu.memory_space<vmem>>, vector<2x4x1xf32>
    %c0_17 = arith.constant 0 : index
    %c0_18 = arith.constant 0 : index
    %c0_19 = arith.constant 0 : index
    %30 = vector.load %arg3[%c0_17, %c0_18, %c0_19] : memref<2x4x1xf32, #tpu.memory_space<vmem>>, vector<2x4x1xf32>
    %31 = vector.broadcast %28 : vector<1x4x1xf32> to vector<2x4x1xf32>
    %32 = arith.mulf %31, %24 : vector<2x4x1xf32>
    %cst_20 = arith.constant 1.000000e+00 : f32
    %33 = vector.broadcast %cst_20 : f32 to vector<1x4x1xf32>
    %34 = arith.subf %33, %28 : vector<1x4x1xf32>
    %35 = vector.broadcast %34 : vector<1x4x1xf32> to vector<2x4x1xf32>
    %36 = vector.broadcast %27 : vector<2x1x1xf32> to vector<2x4x1xf32>
    %37 = arith.mulf %35, %36 : vector<2x4x1xf32>
    %38 = arith.addf %32, %37 : vector<2x4x1xf32>
    %39 = arith.mulf %29, %38 : vector<2x4x1xf32>
    %40 = arith.mulf %32, %7 : vector<2x4x1xf32>
    %41 = vector.broadcast %17 : vector<2x1x1xf32> to vector<2x4x1xf32>
    %42 = arith.mulf %37, %41 : vector<2x4x1xf32>
    %43 = arith.addf %40, %42 : vector<2x4x1xf32>
    %44 = arith.mulf %29, %43 : vector<2x4x1xf32>
    %45 = arith.subf %30, %44 : vector<2x4x1xf32>
    %c0_21 = arith.constant 0 : index
    %c0_22 = arith.constant 0 : index
    %c0_23 = arith.constant 0 : index
    %46 = vector.load %arg1[%c0_21, %c0_22, %c0_23] : memref<2x4x256xf32, #tpu.memory_space<vmem>>, vector<2x4x256xf32>
    %47 = vector.broadcast %39 : vector<2x4x1xf32> to vector<2x4x256xf32>
    %48 = arith.mulf %47, %46 : vector<2x4x256xf32>
    %49 = vector.broadcast %45 : vector<2x4x1xf32> to vector<2x4x256xf32>
    %50 = arith.addf %48, %49 : vector<2x4x256xf32>
    %c0_24 = arith.constant 0 : index
    %c0_25 = arith.constant 0 : index
    %c0_26 = arith.constant 0 : index
    %51 = vector.load %arg5[%c0_24, %c0_25, %c0_26] : memref<2x4x256xf32, #tpu.memory_space<vmem>>, vector<2x4x256xf32>
    tpu.vector_store %arg5[%c0_24, %c0_25, %c0_26], %50 {strides = array<i32>} : memref<2x4x256xf32, #tpu.memory_space<vmem>>, vector<2x4x256xf32>,
    return
  }
  func.func @transform_0(%arg0: i32) -> (i32, i32, i32) {
    %c0_i32 = arith.constant 0 : i32
    %c0_i32_0 = arith.constant 0 : i32
    %c0_i32_1 = arith.constant 0 : i32
    return %arg0, %c0_i32, %c0_i32_0 : i32, i32, i32
  }
  func.func @transform_1(%arg0: i32) -> (i32, i32, i32) {
    %c0_i32 = arith.constant 0 : i32
    %c0_i32_0 = arith.constant 0 : i32
    %c0_i32_1 = arith.constant 0 : i32
    return %arg0, %c0_i32, %c0_i32_0 : i32, i32, i32
  }
  func.func @transform_2(%arg0: i32) -> (i32, i32, i32) {
    %c0_i32 = arith.constant 0 : i32
    %c0_i32_0 = arith.constant 0 : i32
    %c0_i32_1 = arith.constant 0 : i32
    return %arg0, %c0_i32, %c0_i32_0 : i32, i32, i32
  }
  func.func @transform_3(%arg0: i32) -> (i32, i32, i32) {
    %c0_i32 = arith.constant 0 : i32
    %c0_i32_0 = arith.constant 0 : i32
    %c0_i32_1 = arith.constant 0 : i32
    %c0_i32_2 = arith.constant 0 : i32
    return %c0_i32, %c0_i32_0, %c0_i32_1 : i32, i32, i32
  }
  func.func @transform_4(%arg0: i32) -> (i32, i32, i32) {
    %c0_i32 = arith.constant 0 : i32
    %c0_i32_0 = arith.constant 0 : i32
    %c0_i32_1 = arith.constant 0 : i32
    return %arg0, %c0_i32, %c0_i32_0 : i32, i32, i32
  }
}

</mosaic_0001>

<bundles_post_ra>
// kernel: tpu_custom_call.1
= control target key start
LH: loop header
LB: loop body
LE: loop exit
PB: predicated region body
PF: predicated region fallthrough
CT: control target
= control target key end

     0   :  { %vm26_vm0 = vcmask 1043456   ;;  %s320_s0 = inlined_call_operand.vmem [shape: f32[2,4,256], index: 0, kind: input, shape index: {}]   ;;  %s321_s1 = inlined_call_operand.vmem [shape: f32[2,4,1], index: 1, kind: input, shape index: {}]   ;;  %s322_s2 = inlined_call_operand.vmem [shape: f32[2,4,1], index: 2, kind: input, shape index: {}]   ;;  %s323_s3 = inlined_call_operand.vmem [shape: f32[1,4,1], index: 3, kind: input, shape index: {}]   ;;  %s324_s4 = inlined_call_operand.hbm [shape: f32[2,4,256], index: 4, kind: output, shape index: {}]  }
   0x1   :  { %v255_v0 = vld [vmem:[%s320_s0] sm:$0xff]  ;;  %v260_v1 = vld [vmem:[%s320_s0 + $0x8] sm:$0xff] }
   0x2   :  { %9 = vsyncpa [#allocation3], 0  ;;  %v264_v2 = vcombine.high %v255_v0, %v255_v0  ;;  %v27_v3 = vsel %vm26_vm0, %v255_v0, 0.0  ;;  %v37_v4 = vmul.f32 %v255_v0, %v255_v0  ;;  %v272_v5 = vcombine.high %v260_v1, %v260_v1 }
   0x3   :  { %v32_v6 = vsel %vm26_vm0, %v260_v1, 0.0  ;;  %v38_v7 = vmul.f32 %v260_v1, %v260_v1  ;;  %v223_v20 = vmov 0  }
   0x4   :  { %v28_v8 = vsel %vm26_vm0, %v264_v2, 0.0  ;;  %v41_v9 = vcombine.high %v37_v4, %v37_v4  ;;  %v45_v10 = vsel %vm26_vm0, %v37_v4, 0.0  ;;  %v33_v11 = vsel %vm26_vm0, %v272_v5, 0.0  ;;  %189 = vset.pattern.permute.xlu0 %v223_v20  ;;  %190 = vset.pattern.permute.xlu1 %v223_v20  ;;  %v108_v20 = vld [vmem:[%s321_s1] sm:$0xf] }
   0x5   :  { %v29_v12 = vadd.f32 %v28_v8, %v27_v3  ;;  %v42_v13 = vcombine.high %v38_v7, %v38_v7  ;;  %v50_v15 = vsel %vm26_vm0, %v38_v7, 0.0  ;;  %v34_v17 = vadd.f32 %v33_v11, %v32_v6 }
   0x6   :  { %v46_v14 = vsel %vm26_vm0, %v41_v9, 0.0 }
   0x7   :  { %30 = vadd.xlane.f32.xlu0 %v29_v12  ;;  %v47_v16 = vadd.f32 %v46_v14, %v45_v10  ;;  %v51_v18 = vsel %vm26_vm0, %v42_v13, 0.0  ;;  %v107_v14 = vld [vmem:[%s323_s3] sm:$0xf] }
   0x8   :  { %v52_v19 = vadd.f32 %v51_v18, %v50_v15  ;;  %v114_v15 = vsub.f32 1.0, %v107_v14 }
   0x9   :  { %48 = vadd.xlane.f32.xlu1 %v47_v16 }
   0xb   :  { %35 = vadd.xlane.f32.xlu0 %v34_v17 }
   0xd   :  { %53 = vadd.xlane.f32.xlu1 %v52_v19 }
  0x90   :  { %v31_v21 = vpop.xlane.xlu0 %30 }
  0x91   :  { %v286_v22 = vmul.f32 0.00390625, %v31_v21  ;;  %v63_v23 = vsel %vm26_vm0, %v31_v21, 0.0 }
  0x92   :  { %v64_v24 = vrot.slane %v63_v23, 4  ;;  %v49_v25 = vpop.xlane.xlu1 %48 }
  0x93   :  { %v57_v26 = vmul.f32 %v286_v22, %v31_v21  ;;  %v77_v27 = vsel %vm26_vm0, %v49_v25, 0.0 }
  0x94   :  { %v65_v28 = vadd.f32 %v64_v24, %v63_v23  ;;  %v78_v29 = vrot.slane %v77_v27, 4  ;;  %v36_v30 = vpop.xlane.xlu0 %35 }
  0x95   :  { %v291_v31 = vmul.f32 0.00390625, %v36_v30  ;;  %v70_v32 = vsel %vm26_vm0, %v36_v30, 0.0  ;;  %v59_v37 = vsub.f32 %v49_v25, %v57_v26 }
  0x96   :  { %v66_v33 = vrot.slane %v65_v28, 2  ;;  %v79_v34 = vadd.f32 %v78_v29, %v77_v27  ;;  %v71_v35 = vrot.slane %v70_v32, 4  ;;  %v54_v36 = vpop.xlane.xlu1 %53 }
  0x97   :  { %v58_v38 = vmul.f32 %v291_v31, %v36_v30  ;;  %v84_v39 = vsel %vm26_vm0, %v54_v36, 0.0  ;;  %v61_v48 = vmul.f32 0.003921569, %v59_v37  ;;  %v109_v30 = vld [vmem:[%s321_s1 + $0x4] sm:$0xf]  ;;  %s224_s1 = smov [#allocation2]  }
  0x98   :  { %v67_v40 = vadd.f32 %v66_v33, %v65_v28  ;;  %v80_v41 = vrot.slane %v79_v34, 2  ;;  %v72_v42 = vadd.f32 %v71_v35, %v70_v32  ;;  %v85_v43 = vrot.slane %v84_v39, 4  ;;  %s174_s27 = sshll.u32 %s224_s1, 4  ;;  %s175_s27 = int_to_ptr.vmem [resolvable:$true] %s174_s27 }
  0x99   :  { %v60_v49 = vsub.f32 %v54_v36, %v58_v38  ;;  %v99_v57 = vadd.f32 1e-05, %v61_v48  ;;  %p206_p1 = scmp.lt.s32.totalorder %s175_s27, %s175_s27 }
  0x9a   :  { %v68_v44 = vrot.slane %v67_v40, 1  ;;  %v81_v45 = vadd.f32 %v80_v41, %v79_v34  ;;  %v73_v46 = vrot.slane %v72_v42, 2  ;;  %v86_v47 = vadd.f32 %v85_v43, %v84_v39 }
  0x9b   :  { %v62_v58 = vmul.f32 0.003921569, %v60_v49  ;;  %193 = vrsqrt.f32 %v99_v57 }
  0x9c   :  { %v69_v50 = vadd.f32 %v68_v44, %v67_v40  ;;  %v82_v51 = vrot.slane %v81_v45, 1  ;;  %v74_v52 = vadd.f32 %v73_v46, %v72_v42  ;;  %v87_v53 = vrot.slane %v86_v47, 2  ;;  %v111_v40 = vld [vmem:[%s322_s2 + $0x4] sm:$0xf] }
  0x9d   :  { %v100_v4 = vadd.f32 1e-05, %v62_v58 }
  0x9e   :  { %v91_v54 = vmul.f32 0.0009765625, %v69_v50  ;;  %v75_v55 = vrot.slane %v74_v52, 1  ;;  %v88_v56 = vadd.f32 %v87_v53, %v86_v47  ;;  %v83_v60 = vadd.f32 %v82_v51, %v81_v45 }
  0x9f   :  { %195 = vrsqrt.f32 %v100_v4 }
  0xa0   :  { %v93_v59 = vmul.f32 %v91_v54, %v69_v50  ;;  %v76_v61 = vadd.f32 %v75_v55, %v74_v52  ;;  %v89_v62 = vrot.slane %v88_v56, 1 }
  0xa2   :  { %v95_v63 = vsub.f32 %v83_v60, %v93_v59  ;;  %v92_v3 = vmul.f32 0.0009765625, %v76_v61  ;;  %v90_v8 = vadd.f32 %v89_v62, %v88_v56 }
  0xa4   :  { %v97_v6 = vmul.f32 0.0009775171, %v95_v63  ;;  %v94_v7 = vmul.f32 %v92_v3, %v76_v61 }
  0xa6   :  { %v103_v9 = vadd.f32 1e-05, %v97_v6  ;;  %v96_v10 = vsub.f32 %v90_v8, %v94_v7 }
  0xa8   :  { %197 = vrsqrt.f32 %v103_v9  ;;  %v98_v11 = vmul.f32 0.0009775171, %v96_v10  ;;  %v194_v13 = vpop.eup %193 }
  0xa9   :  { %v112_v17 = vmul.f32 %v194_v13, %v107_v14 }
  0xaa   :  { %v104_v12 = vadd.f32 1e-05, %v98_v11 }
  0xab   :  { %v121_v24 = vmul.f32 %v112_v17, %v286_v22  ;;  %v110_v22 = vld [vmem:[%s322_s2] sm:$0xf]  ;;  %s201_s2 = scalar_lea.vmem %s175_s27, 256 }
  0xac   :  { %199 = vrsqrt.f32 %v104_v12  ;;  %v196_v16 = vpop.eup %195  ;;  %p202_p0 = scmp.ne.s32.totalorder %s175_s27, %s201_s2  ;;  %p207_p2 = scmp.lt.s32.totalorder %s201_s2, %s201_s2 }
  0xad   :  { %v113_v23 = vmul.f32 %v196_v16, %v107_v14 }
  0xae   :  { %p208_p3 = por %p207_p2, %p206_p1 }
  0xaf   :  { %v122_v33 = vmul.f32 %v113_v23, %v291_v31 }
  0xb0   :  { %p209_p4 = pnand %p208_p3, %p202_p0 }
  0xb5   :  { %v198_v18 = vpop.eup %197 }
  0xb6   :  { %v115_v19 = vmul.f32 %v198_v18, %v114_v15 }
  0xb8   :  { %v117_v21 = vadd.f32 %v115_v19, %v112_v17  ;;  %v123_v25 = vmul.f32 %v115_v19, %v91_v54 }
  0xb9   :  { %v200_v26 = vpop.eup %199 }
  0xba   :  { %v119_v27 = vmul.f32 %v117_v21, %v108_v20  ;;  %v116_v28 = vmul.f32 %v200_v26, %v114_v15  ;;  %v125_v29 = vadd.f32 %v123_v25, %v121_v24 }
  0xbc   :  { %133 = vperm.xlu0 %189, %v119_v27   ;;  %v118_v32 = vadd.f32 %v116_v28, %v113_v23  ;;  %v124_v34 = vmul.f32 %v116_v28, %v92_v3  ;;  %v127_v36 = vmul.f32 %v125_v29, %v108_v20 }
  0xbe   :  { %v120_v35 = vmul.f32 %v118_v32, %v109_v30  ;;  %v126_v37 = vadd.f32 %v124_v34, %v122_v33  ;;  %v129_v38 = vsub.f32 %v110_v22, %v127_v36 }
  0xc0   :  { %138 = vperm.xlu1 %190, %v120_v35   ;;  %v128_v39 = vmul.f32 %v126_v37, %v109_v30 }
  0xc2   :  { %v130_v41 = vsub.f32 %v111_v40, %v128_v39 }
  0xc4   :  { %147 = vperm.xlu1 %190, %v129_v38  }
  0xc8   :  { %152 = vperm.xlu1 %190, %v130_v41  }
 0x137   :  { %v134_v42 = vpop.permute.xlu0 %133 }
 0x138   :  { %v141_v43 = vmul.f32 %v134_v42, %v255_v0  ;;  %v142_v44 = vmul.f32 %v134_v42, %v264_v2 }
 0x13b   :  { %v139_v31 = vpop.permute.xlu1 %138 }
 0x13c   :  { %v143_v48 = vmul.f32 %v139_v31, %v260_v1  ;;  %v144_v49 = vmul.f32 %v139_v31, %v272_v5 }
 0x13f   :  { %v148_v45 = vpop.permute.xlu1 %147 }
 0x140   :  { %v155_v46 = vadd.f32 %v148_v45, %v141_v43  ;;  %v156_v47 = vadd.f32 %v148_v45, %v142_v44 }
 0x142   :  { %v163_v50 = vcombine.low %v155_v46, %v156_v47 }
 0x143   :  { %v153_v51 = vpop.permute.xlu1 %152 }
 0x144   :  { %167 = vst [vmem:[#allocation2] sm:$0xff] %v163_v50  ;;  %v157_v52 = vadd.f32 %v153_v51, %v143_v48  ;;  %v158_v53 = vadd.f32 %v153_v51, %v144_v49 }
 0x146   :  { %v164_v54 = vcombine.low %v157_v52, %v158_v53 }
 0x148   :  { %168 = vst [vmem:[#allocation2 + $0x8] sm:$0xff] %v164_v54 }
 0x149   :  { %212 = shalt.err (!%p209_p4)
}
 0x14a   :  { %s225_s28 = smov 128   ;;  %s226_s29 = smov 8  }
 0x14b   :  { %180 = dma.vmem_to_hbm [thread:$0]  %s175_s27, 256, %s324_s4, [#allocation3], %s225_s28, %s225_s28, %s226_s29  }
 0x14c   :  { %221 = dma.done.wait [#allocation3], 256  }
 0x14d   :  { %222 = vsyncadd [#allocation3], 4294967040 }
 0x14e   :  { %184 = vsyncpa [#allocation3], 1 }

</bundles_post_ra>
